<compile_context>
chip_gen: v5e
topology: v5e:2x2
jax: 0.10.0
libtpu: 0.0.40
codegen_flags: <defaults>
</compile_context>

<pallas_src>
import jax
import jax.numpy as jnp
from jax.experimental import pallas as pl
from jax.experimental.pallas import tpu as pltpu

_LANE = 128
_SUBLANE = 8


def _edge_index_copy_kernel(n_ref, out_ref):
    # The module has no compute; this is a pure element copy of the tile.
    out_ref[...] = n_ref[...]


def _tile_cap_bytes() -> int:
    """Per-tile byte cap, generation aware (best effort)."""
    cap = 2 * 1024 * 1024  # safe everywhere: 4x tile <= 8 MiB < v5e's 16 MiB scoped VMEM
    try:
        info = pltpu.get_tpu_info()
        name = str(getattr(info, "chip_version", "")).lower()
        if name and "5" not in name:
            # v6e / v7x: 32 MiB default scoped VMEM -> 4 MiB tiles (4x = 16 MiB)
            cap = 4 * 1024 * 1024
    except Exception:
        pass
    return cap


def _pick_tiles(rows: int, cols: int, itemsize: int, cap_bytes: int):
    """Choose (tile_r, tile_c) so tile bytes <= cap and the (8,128) rule holds.

    Rule: each of the last two block dims must be a multiple of (8, 128)
    respectively OR equal the full array dim.  No padding is ever introduced.
    """
    cap_elems = max(1, cap_bytes // max(1, itemsize))

    if cols % _LANE != 0:
        # Cannot tile lanes without padding -> keep the full (possibly ragged)
        # column extent; Pallas emits masked stores for the ragged lanes.
        tile_c = cols
    else:
        # Lane-tileable: size column tiles so an 8-row slab stays under cap.
        tile_c = min(cols, max(_LANE, (cap_elems // _SUBLANE) // _LANE * _LANE))

    max_r = max(1, cap_elems // max(1, tile_c))
    if max_r >= rows:
        tile_r = rows                      # full dim -> always legal
    else:
        tile_r = max(_SUBLANE, (max_r // _SUBLANE) * _SUBLANE)
        if tile_r >= rows:
            tile_r = rows
    return tile_r, tile_c


def pallas_copy(n: jax.Array) -> jax.Array:
    """Materialize a bit-exact copy of a 2-D array with a tiled Pallas kernel."""
    assert n.ndim == 2, "pallas_copy expects a 2-D array"
    rows, cols = n.shape
    itemsize = jnp.dtype(n.dtype).itemsize

    tile_r, tile_c = _pick_tiles(rows, cols, itemsize, _tile_cap_bytes())
    grid = (pl.cdiv(rows, tile_r), pl.cdiv(cols, tile_c))
    spec = pl.BlockSpec((tile_r, tile_c), lambda i, j: (i, j))

    return pl.pallas_call(
        _edge_index_copy_kernel,
        out_shape=jax.ShapeDtypeStruct((rows, cols), n.dtype),
        grid_spec=pltpu.PrefetchScalarGridSpec(
            num_scalar_prefetch=0,
            grid=grid,
            in_specs=[spec],
            out_specs=spec,
        ),
        compiler_params=pltpu.CompilerParams(
            dimension_semantics=("parallel", "parallel"),
        ),
        cost_estimate=pl.CostEstimate(
            flops=0,
            transcendentals=0,
            bytes_accessed=2 * rows * cols * itemsize,
        ),
    )(n)


def edge_index_forward(n: jax.Array, materialize_second: bool = False):
    """Pallas-side equivalent of EdgeIndex.forward.

    PyTorch returns the same tensor twice (aliased), so the default path does
    exactly that — zero HBM traffic.  Set `materialize_second=True` to get a
    distinct buffer for the second element via the Pallas copy kernel.
    """
    if materialize_second and n.ndim == 2:
        return n, pallas_copy(n)
    return n, n


if __name__ == "__main__":
    key = jax.random.PRNGKey(0)
    k0, k1, k2 = jax.random.split(key, 3)

    # Small, generic input.
    n = jax.random.normal(k0, (256, 128), dtype=jnp.float32)

    # Faithful (aliased) forward — the recommended path.
    a, b = edge_index_forward(n)

    # Kernel-demonstrating forward with a materialized second buffer.
    a2, b2 = edge_index_forward(n, materialize_second=True)

    # Also exercise shapes that stress the tiling rules without any padding:
    #   (E, 2): narrow, non-128-aligned columns -> full-column blocks.
    #   (2, E): canonical edge-index layout, rows < 8 -> full-row blocks,
    #           column-tiled grid.
    narrow = jax.random.normal(k1, (64, 2), dtype=jnp.float32)
    wide = jax.random.normal(k2, (2, 384), dtype=jnp.float32)
    narrow_copy = pallas_copy(narrow)
    wide_copy = pallas_copy(wide)

    jax.block_until_ready((a, b, a2, b2, narrow_copy, wide_copy))

    assert a.shape == n.shape and b.shape == n.shape
    assert a2.shape == n.shape and b2.shape == n.shape
    assert a.dtype == n.dtype and b.dtype == n.dtype and b2.dtype == n.dtype
    assert bool(jnp.all(a == n)) and bool(jnp.all(b == n))
    assert bool(jnp.all(a2 == n)) and bool(jnp.all(b2 == n))
    assert bool(jnp.all(narrow_copy == narrow))
    assert bool(jnp.all(wide_copy == wide))

    print("KERNEL_OK")
</pallas_src>

<mosaic_0001>
module attributes {stable_mosaic.version = 11 : i64} {
  func.func @_edge_index_copy_kernel(%arg0: i32, %arg1: i32, %arg2: memref<256x128xf32, #tpu.memory_space<vmem>>, %arg3: memref<256x128xf32, #tpu.memory_space<vmem>>) attributes {dimension_semantics = [#tpu.dimension_semantics<parallel>, #tpu.dimension_semantics<parallel>], iteration_bounds = array<i64: 1, 1>, scalar_prefetch = 0 : i64, scratch_operands = 0 : i64, tpu.core_type = #tpu.core_type<tc>, window_params = [{transform_indices = @transform_0, window_bounds = array<i64: 256, 128>}, {transform_indices = @transform_1, window_bounds = array<i64: 256, 128>}]} {
    %c0 = arith.constant 0 : index
    %c0_0 = arith.constant 0 : index
    %0 = vector.load %arg2[%c0, %c0_0] : memref<256x128xf32, #tpu.memory_space<vmem>>, vector<256x128xf32>
    %c0_1 = arith.constant 0 : index
    %c0_2 = arith.constant 0 : index
    %1 = vector.load %arg3[%c0_1, %c0_2] : memref<256x128xf32, #tpu.memory_space<vmem>>, vector<256x128xf32>
    tpu.vector_store %arg3[%c0_1, %c0_2], %0 {strides = array<i32>} : memref<256x128xf32, #tpu.memory_space<vmem>>, vector<256x128xf32>,
    return
  }
  func.func @transform_0(%arg0: i32, %arg1: i32) -> (i32, i32) {
    %c0_i32 = arith.constant 0 : i32
    return %arg0, %arg1 : i32, i32
  }
  func.func @transform_1(%arg0: i32, %arg1: i32) -> (i32, i32) {
    %c0_i32 = arith.constant 0 : i32
    return %arg0, %arg1 : i32, i32
  }
}

</mosaic_0001>

<bundles_post_ra>
// kernel: tpu_custom_call.1
= control target key start
LH: loop header
LB: loop body
LE: loop exit
PB: predicated region body
PF: predicated region fallthrough
CT: control target
= control target key end

     0   :  { %6 = vsyncpa [#allocation3], 0  ;;  %s190_s0 = inlined_call_operand.hbm [shape: f32[256,128], index: 0, kind: input, shape index: {}]   ;;  %s191_s1 = inlined_call_operand.hbm [shape: f32[256,128], index: 1, kind: output, shape index: {}]  }
   0x1   :  { %7 = vsyncpa [#allocation4], 0  ;;  %s12_s8 = sshll.u32 %s190_s0, 4  ;;  %s164_s9 = smov [#allocation2]   ;;  %s13_s8 = int_to_ptr.hbm [resolvable:$true] %s12_s8 }
   0x2   :  { %s14_s10 = sshll.u32 %s164_s9, 4  ;;  %s165_s11 = smov 128   ;;  %s15_s10 = int_to_ptr.vmem [resolvable:$true] %s14_s10 }
   0x3   :  { %s166_s12 = smov 8  }
   0x4   :  { %20 = dma.hbm_to_vmem [thread:$0]  %s13_s8, 4096, %s15_s10, [#allocation3], %s165_s11, %s165_s11, %s166_s12  }
   0x5   :  { %160 = dma.done.wait [#allocation3], 4096  }
   0x6   :  { %161 = vsyncadd [#allocation3], 4294963200  ;;  %v25_v0 = vld [vmem:[#allocation2] sm:$0xff]  ;;  %v26_v1 = vld [vmem:[#allocation2 + $0x8] sm:$0xff]  ;;  %s167_s0 = smov [#allocation5]   ;;  %s95_s16 = sshll.u32 %s191_s1, 4  ;;  %s96_s16 = int_to_ptr.hbm [resolvable:$true] %s95_s16 }
   0x7   :  { %v27_v2 = vld [vmem:[#allocation2 + $0x10] sm:$0xff]  ;;  %57 = vst [vmem:[#allocation5] sm:$0xff] %v25_v0  ;;  %v28_v3 = vld [vmem:[#allocation2 + $0x18] sm:$0xff]  ;;  %v29_v4 = vld [vmem:[#allocation2 + $0x20] sm:$0xff]  ;;  %s93_s13 = sshll.u32 %s167_s0, 4  ;;  %s94_s13 = int_to_ptr.vmem [resolvable:$true] %s93_s13 }
   0x8   :  { %58 = vst [vmem:[#allocation5 + $0x8] sm:$0xff] %v26_v1  ;;  %v30_v5 = vld [vmem:[#allocation2 + $0x28] sm:$0xff]  ;;  %v31_v6 = vld [vmem:[#allocation2 + $0x30] sm:$0xff]  ;;  %v32_v7 = vld [vmem:[#allocation2 + $0x38] sm:$0xff] }
   0x9   :  { %59 = vst [vmem:[#allocation5 + $0x10] sm:$0xff] %v27_v2  ;;  %v33_v8 = vld [vmem:[#allocation2 + $0x40] sm:$0xff]  ;;  %v34_v9 = vld [vmem:[#allocation2 + $0x48] sm:$0xff]  ;;  %v35_v10 = vld [vmem:[#allocation2 + $0x50] sm:$0xff] }
   0xa   :  { %60 = vst [vmem:[#allocation5 + $0x18] sm:$0xff] %v28_v3  ;;  %v36_v11 = vld [vmem:[#allocation2 + $0x58] sm:$0xff]  ;;  %v37_v12 = vld [vmem:[#allocation2 + $0x60] sm:$0xff]  ;;  %v38_v13 = vld [vmem:[#allocation2 + $0x68] sm:$0xff] }
   0xb   :  { %61 = vst [vmem:[#allocation5 + $0x20] sm:$0xff] %v29_v4  ;;  %v39_v14 = vld [vmem:[#allocation2 + $0x70] sm:$0xff]  ;;  %v40_v15 = vld [vmem:[#allocation2 + $0x78] sm:$0xff]  ;;  %v41_v16 = vld [vmem:[#allocation2 + $0x80] sm:$0xff] }
   0xc   :  { %62 = vst [vmem:[#allocation5 + $0x28] sm:$0xff] %v30_v5  ;;  %v42_v17 = vld [vmem:[#allocation2 + $0x88] sm:$0xff]  ;;  %v43_v18 = vld [vmem:[#allocation2 + $0x90] sm:$0xff]  ;;  %v44_v19 = vld [vmem:[#allocation2 + $0x98] sm:$0xff] }
   0xd   :  { %63 = vst [vmem:[#allocation5 + $0x30] sm:$0xff] %v31_v6  ;;  %v45_v20 = vld [vmem:[#allocation2 + $0xa0] sm:$0xff]  ;;  %v46_v21 = vld [vmem:[#allocation2 + $0xa8] sm:$0xff]  ;;  %v47_v22 = vld [vmem:[#allocation2 + $0xb0] sm:$0xff] }
   0xe   :  { %64 = vst [vmem:[#allocation5 + $0x38] sm:$0xff] %v32_v7  ;;  %v48_v23 = vld [vmem:[#allocation2 + $0xb8] sm:$0xff]  ;;  %v49_v24 = vld [vmem:[#allocation2 + $0xc0] sm:$0xff]  ;;  %v50_v25 = vld [vmem:[#allocation2 + $0xc8] sm:$0xff] }
   0xf   :  { %65 = vst [vmem:[#allocation5 + $0x40] sm:$0xff] %v33_v8  ;;  %v51_v26 = vld [vmem:[#allocation2 + $0xd0] sm:$0xff]  ;;  %v52_v27 = vld [vmem:[#allocation2 + $0xd8] sm:$0xff]  ;;  %v53_v28 = vld [vmem:[#allocation2 + $0xe0] sm:$0xff] }
  0x10   :  { %66 = vst [vmem:[#allocation5 + $0x48] sm:$0xff] %v34_v9  ;;  %v54_v29 = vld [vmem:[#allocation2 + $0xe8] sm:$0xff]  ;;  %v55_v30 = vld [vmem:[#allocation2 + $0xf0] sm:$0xff]  ;;  %v56_v31 = vld [vmem:[#allocation2 + $0xf8] sm:$0xff] }
  0x11   :  { %67 = vst [vmem:[#allocation5 + $0x50] sm:$0xff] %v35_v10 }
  0x12   :  { %68 = vst [vmem:[#allocation5 + $0x58] sm:$0xff] %v36_v11 }
  0x13   :  { %69 = vst [vmem:[#allocation5 + $0x60] sm:$0xff] %v37_v12 }
  0x14   :  { %70 = vst [vmem:[#allocation5 + $0x68] sm:$0xff] %v38_v13 }
  0x15   :  { %71 = vst [vmem:[#allocation5 + $0x70] sm:$0xff] %v39_v14 }
  0x16   :  { %72 = vst [vmem:[#allocation5 + $0x78] sm:$0xff] %v40_v15 }
  0x17   :  { %73 = vst [vmem:[#allocation5 + $0x80] sm:$0xff] %v41_v16 }
  0x18   :  { %74 = vst [vmem:[#allocation5 + $0x88] sm:$0xff] %v42_v17 }
  0x19   :  { %75 = vst [vmem:[#allocation5 + $0x90] sm:$0xff] %v43_v18 }
  0x1a   :  { %76 = vst [vmem:[#allocation5 + $0x98] sm:$0xff] %v44_v19 }
  0x1b   :  { %77 = vst [vmem:[#allocation5 + $0xa0] sm:$0xff] %v45_v20 }
  0x1c   :  { %78 = vst [vmem:[#allocation5 + $0xa8] sm:$0xff] %v46_v21 }
  0x1d   :  { %79 = vst [vmem:[#allocation5 + $0xb0] sm:$0xff] %v47_v22 }
  0x1e   :  { %80 = vst [vmem:[#allocation5 + $0xb8] sm:$0xff] %v48_v23 }
  0x1f   :  { %81 = vst [vmem:[#allocation5 + $0xc0] sm:$0xff] %v49_v24 }
  0x20   :  { %82 = vst [vmem:[#allocation5 + $0xc8] sm:$0xff] %v50_v25 }
  0x21   :  { %83 = vst [vmem:[#allocation5 + $0xd0] sm:$0xff] %v51_v26 }
  0x22   :  { %84 = vst [vmem:[#allocation5 + $0xd8] sm:$0xff] %v52_v27 }
  0x23   :  { %85 = vst [vmem:[#allocation5 + $0xe0] sm:$0xff] %v53_v28 }
  0x24   :  { %86 = vst [vmem:[#allocation5 + $0xe8] sm:$0xff] %v54_v29 }
  0x25   :  { %87 = vst [vmem:[#allocation5 + $0xf0] sm:$0xff] %v55_v30 }
  0x26   :  { %88 = vst [vmem:[#allocation5 + $0xf8] sm:$0xff] %v56_v31 }
  0x27   :  { %101 = dma.vmem_to_hbm [thread:$0]  %s94_s13, 4096, %s96_s16, [#allocation4], %s165_s11, %s165_s11, %s166_s12  }
  0x28   :  { %162 = dma.done.wait [#allocation4], 4096  }
  0x29   :  { %163 = vsyncadd [#allocation4], 4294963200 }
  0x2a   :  { %106 = vsyncpa [#allocation3], 1 }
  0x2b   :  { %107 = vsyncpa [#allocation4], 1 }

</bundles_post_ra>
